<compile_context>
chip_gen: v5e
topology: v5e:2x2
jax: 0.10.0
libtpu: 0.0.40
codegen_flags: <defaults>
</compile_context>

<pallas_src>
import functools

import jax
import jax.numpy as jnp
import numpy as np
from jax import lax
from jax.experimental import pallas as pl
from jax.experimental.pallas import tpu as pltpu


def _assigner_kernel(x_ref,     # (bn, T, D)   f32 activations for this batch block
                     len_ref,   # (bn, 1)      int32 sequence lengths
                     wc_ref,    # (L, K*D, D)  bf16 conv weights (taps stacked on rows)
                     bc_ref,    # (L, 1, D)    f32 conv biases
                     wl_ref,    # (1, D)       f32 final linear weight (row vector)
                     bl_ref,    # (1, 1)       f32 final linear bias (SMEM scalar)
                     out_ref,   # (bn, T)      f32 masked alphas (lane-dense over T)
                     *, n_layers, w_context):
    bn, t_len, d_model = x_ref.shape
    K = w_context
    M = bn * t_len
    pad_left = (K - 1) // 2          # matches PyTorch 'same' padding for odd w_context

    x2 = x_ref[...].astype(jnp.float32).reshape(M, d_model)          # (M, D)

    # Local time index of every flattened row.  The boundary masks below (a) implement
    # the zero 'same'-padding and (b) prevent the circular roll from leaking data across
    # batch elements packed into the same block.
    t_local = lax.broadcasted_iota(jnp.int32, (bn, t_len, 1), 1).reshape(M, 1)
    shift_valid = {}
    for k in range(K):
        d = k - pad_left
        if d != 0:
            shift_valid[k] = jnp.logical_and(t_local + d >= 0, t_local + d < t_len)

    # ---- conv stack: n_layers x [conv1d('same') + ReLU], one fused MXU matmul each ----
    for l in range(n_layers):
        cols = []
        for k in range(K):
            d = k - pad_left
            if d == 0:
                cols.append(x2)
            else:
                rolled = pltpu.roll(x2, shift=(-d) % M, axis=0)       # XLU sublane roll
                cols.append(jnp.where(shift_valid[k], rolled, 0.0))
        win = cols[0] if K == 1 else jnp.concatenate(cols, axis=-1)   # (M, K*D)
        y = jnp.dot(win.astype(jnp.bfloat16), wc_ref[l],
                    preferred_element_type=jnp.float32)               # (M, D), f32 acc
        y = y + bc_ref[l]                                             # (1, D) broadcast
        x2 = jnp.maximum(y, 0.0)                                      # ReLU (f32, VPU)

    # ---- dropout: identity at eval time ----

    # ---- linear(D -> 1) + sigmoid on VPU/XLU (no 1-column MXU matmul) ----
    w_row = wl_ref[...].reshape(1, 1, d_model)
    logits = jnp.sum(x2.reshape(bn, t_len, d_model) * w_row, axis=-1)  # (bn, T)
    logits = logits + bl_ref[0, 0]
    alphas = jax.nn.sigmoid(logits)

    # ---- sequence mask; T stays on the lane axis for a dense store ----
    t_idx = lax.broadcasted_iota(jnp.int32, (bn, t_len), 1)
    mask = t_idx < len_ref[...]                                        # (bn, 1) bcast
    out_ref[...] = jnp.where(mask, alphas, 0.0)


def attention_assigner(x, input_lengths, conv_w, conv_b, lin_w, lin_b,
                       *, n_layers, w_context):
    """x: (N, T, D) f32 ; input_lengths: (N,) -> alphas (N, T) f32."""
    N, T, D = x.shape
    K = w_context

    # Batch block: pack several sequences per grid step to fill the MXU M dimension.
    bn = N if N < 8 else 8
    n_pad = (-N) % bn
    lengths = input_lengths.astype(jnp.int32)
    if n_pad:
        x = jnp.pad(x, ((0, n_pad), (0, 0), (0, 0)))
        lengths = jnp.pad(lengths, ((0, n_pad),))
    Np = N + n_pad
    lengths = lengths.reshape(Np, 1)

    wc = conv_w.reshape(n_layers, K * D, D).astype(jnp.bfloat16)   # taps fused on rows
    bc = conv_b.reshape(n_layers, 1, D).astype(jnp.float32)
    wl = lin_w.reshape(1, D).astype(jnp.float32)
    bl = lin_b.reshape(1, 1).astype(jnp.float32)

    kern = functools.partial(_assigner_kernel, n_layers=n_layers, w_context=K)

    # TODO(synk): for long sequences / large D (esp. 64-MiB-VMEM v7x) add a second
    # parallel time-tile grid axis with a (K-1) halo instead of taking the full T here.
    out = pl.pallas_call(
        kern,
        out_shape=jax.ShapeDtypeStruct((Np, T), jnp.float32),
        grid_spec=pltpu.PrefetchScalarGridSpec(
            num_scalar_prefetch=0,
            grid=(Np // bn,),
            in_specs=[
                pl.BlockSpec((bn, T, D), lambda n: (n, 0, 0)),
                pl.BlockSpec((bn, 1), lambda n: (n, 0)),
                pl.BlockSpec((n_layers, K * D, D), lambda n: (0, 0, 0)),
                pl.BlockSpec((n_layers, 1, D), lambda n: (0, 0, 0)),
                pl.BlockSpec((1, D), lambda n: (0, 0)),
                pl.BlockSpec(memory_space=pltpu.MemorySpace.SMEM),
            ],
            out_specs=pl.BlockSpec((bn, T), lambda n: (n, 0)),
        ),
        compiler_params=pltpu.CompilerParams(
            dimension_semantics=("parallel",)),
    )(x.astype(jnp.float32), lengths, wc, bc, wl, bl)
    return out[:N]


def _reference(x, lengths, conv_w, conv_b, lin_w, lin_b, *, n_layers, w_context):
    """Pure-JAX reference of the same forward pass (for correctness check)."""
    N, T, D = x.shape
    pad_left = (w_context - 1) // 2
    pad_right = w_context - 1 - pad_left
    h = x
    for l in range(n_layers):
        hp = jnp.pad(h, ((0, 0), (pad_left, pad_right), (0, 0)))
        out = jnp.broadcast_to(conv_b[l][None], (N, T, D)).astype(jnp.float32)
        for k in range(w_context):
            out = out + jnp.einsum('ntd,de->nte', hp[:, k:k + T, :], conv_w[l, k])
        h = jnp.maximum(out, 0.0)
    logits = jnp.einsum('ntd,do->nto', h, lin_w)[..., 0] + lin_b[0, 0]
    alphas = jax.nn.sigmoid(logits)
    mask = (jnp.arange(T)[None, :] < lengths[:, None]).astype(alphas.dtype)
    return alphas * mask


if __name__ == "__main__":
    # config: d_model=32, n_layers=2, w_context=3, dropout=0.1 (identity at eval)
    N, T, D = 2, 16, 32
    n_layers, w_context = 2, 3

    key = jax.random.PRNGKey(0)
    k_x, k_wc, k_bc, k_wl, k_bl = jax.random.split(key, 5)

    x = jax.random.normal(k_x, (N, T, D), dtype=jnp.float32)
    input_lengths = jnp.array([T, 11], dtype=jnp.int32)

    # Deterministic parameter init (synthetic; not a checkpoint load).
    conv_w = jax.random.normal(k_wc, (n_layers, w_context, D, D), jnp.float32) * 0.1
    conv_b = jax.random.normal(k_bc, (n_layers, 1, D), jnp.float32) * 0.05
    lin_w = jax.random.normal(k_wl, (D, 1), jnp.float32) * 0.1
    lin_b = jax.random.normal(k_bl, (1, 1), jnp.float32) * 0.05

    alphas = attention_assigner(x, input_lengths, conv_w, conv_b, lin_w, lin_b,
                                n_layers=n_layers, w_context=w_context)
    alphas = jax.block_until_ready(alphas)

    ref = _reference(x, input_lengths, conv_w, conv_b, lin_w, lin_b,
                     n_layers=n_layers, w_context=w_context)
    np.testing.assert_allclose(np.asarray(alphas), np.asarray(ref),
                               rtol=2e-2, atol=2e-2)
    assert alphas.shape == (N, T)

    print("KERNEL_OK")
</pallas_src>

<mosaic_0001>
module attributes {stable_mosaic.version = 11 : i64} {
  func.func @_assigner_kernel(%arg0: i32, %arg1: memref<2x16x32xf32, #tpu.memory_space<vmem>>, %arg2: memref<2x1xi32, #tpu.memory_space<vmem>>, %arg3: memref<2x96x32xbf16, #tpu.memory_space<vmem>>, %arg4: memref<2x1x32xf32, #tpu.memory_space<vmem>>, %arg5: memref<1x32xf32, #tpu.memory_space<vmem>>, %arg6: memref<1x1xf32, #tpu.memory_space<smem>>, %arg7: memref<2x16xf32, #tpu.memory_space<vmem>>) attributes {dimension_semantics = [#tpu.dimension_semantics<parallel>], iteration_bounds = array<i64: 1>, scalar_prefetch = 0 : i64, scratch_operands = 0 : i64, tpu.core_type = #tpu.core_type<tc>, window_params = [{transform_indices = @transform_0, window_bounds = array<i64: 2, 16, 32>}, {transform_indices = @transform_1, window_bounds = array<i64: 2, 1>}, {pipeline_mode = #tpu.pipeline_mode<synchronous>, transform_indices = @transform_2, window_bounds = array<i64: 2, 96, 32>}, {pipeline_mode = #tpu.pipeline_mode<synchronous>, transform_indices = @transform_3, window_bounds = array<i64: 2, 1, 32>}, {pipeline_mode = #tpu.pipeline_mode<synchronous>, transform_indices = @transform_4, window_bounds = array<i64: 1, 32>}, {transform_indices = @transform_5, window_bounds = array<i64: 1, 1>}, {transform_indices = @transform_6, window_bounds = array<i64: 2, 16>}]} {
    %c0 = arith.constant 0 : index
    %c0_0 = arith.constant 0 : index
    %c0_1 = arith.constant 0 : index
    %0 = vector.load %arg1[%c0, %c0_0, %c0_1] : memref<2x16x32xf32, #tpu.memory_space<vmem>>, vector<2x16x32xf32>
    %1 = vector.shape_cast %0 : vector<2x16x32xf32> to vector<32x32xf32>
    %2 = tpu.iota {dimensions = array<i32: 1>} : vector<2x16x1xi32>
    %3 = vector.shape_cast %2 : vector<2x16x1xi32> to vector<32x1xi32>
    %c-1_i32 = arith.constant -1 : i32
    %4 = vector.broadcast %c-1_i32 : i32 to vector<32x1xi32>
    %5 = arith.addi %3, %4 : vector<32x1xi32>
    %c0_i32 = arith.constant 0 : i32
    %6 = vector.broadcast %c0_i32 : i32 to vector<32x1xi32>
    %7 = arith.cmpi sge, %5, %6 : vector<32x1xi32>
    %c-1_i32_2 = arith.constant -1 : i32
    %8 = vector.broadcast %c-1_i32_2 : i32 to vector<32x1xi32>
    %9 = arith.addi %3, %8 : vector<32x1xi32>
    %c16_i32 = arith.constant 16 : i32
    %10 = vector.broadcast %c16_i32 : i32 to vector<32x1xi32>
    %11 = arith.cmpi slt, %9, %10 : vector<32x1xi32>
    %12 = arith.andi %7, %11 : vector<32x1xi1>
    %c1_i32 = arith.constant 1 : i32
    %13 = vector.broadcast %c1_i32 : i32 to vector<32x1xi32>
    %14 = arith.addi %3, %13 : vector<32x1xi32>
    %c0_i32_3 = arith.constant 0 : i32
    %15 = vector.broadcast %c0_i32_3 : i32 to vector<32x1xi32>
    %16 = arith.cmpi sge, %14, %15 : vector<32x1xi32>
    %c1_i32_4 = arith.constant 1 : i32
    %17 = vector.broadcast %c1_i32_4 : i32 to vector<32x1xi32>
    %18 = arith.addi %3, %17 : vector<32x1xi32>
    %c16_i32_5 = arith.constant 16 : i32
    %19 = vector.broadcast %c16_i32_5 : i32 to vector<32x1xi32>
    %20 = arith.cmpi slt, %18, %19 : vector<32x1xi32>
    %21 = arith.andi %16, %20 : vector<32x1xi1>
    %c1_i32_6 = arith.constant 1 : i32
    %22 = tpu.dynamic_rotate %1 by %c1_i32_6 dim 0 : vector<32x32xf32>, i32 -> vector<32x32xf32>
    %cst = arith.constant 0.000000e+00 : f32
    %23 = vector.shape_cast %12 : vector<32x1xi1> to vector<32x1xi1>
    %24 = vector.broadcast %23 : vector<32x1xi1> to vector<32x32xi1>
    %25 = vector.broadcast %cst : f32 to vector<32x32xf32>
    %26 = arith.select %24, %22, %25 : vector<32x32xi1>, vector<32x32xf32>
    %c31_i32 = arith.constant 31 : i32
    %27 = tpu.dynamic_rotate %1 by %c31_i32 dim 0 : vector<32x32xf32>, i32 -> vector<32x32xf32>
    %cst_7 = arith.constant 0.000000e+00 : f32
    %28 = vector.shape_cast %21 : vector<32x1xi1> to vector<32x1xi1>
    %29 = vector.broadcast %28 : vector<32x1xi1> to vector<32x32xi1>
    %30 = vector.broadcast %cst_7 : f32 to vector<32x32xf32>
    %31 = arith.select %29, %27, %30 : vector<32x32xi1>, vector<32x32xf32>
    %32 = tpu.concatenate %26, %1, %31 in 1 : vector<32x32xf32>, vector<32x32xf32>, vector<32x32xf32> -> vector<32x96xf32>
    %33 = arith.truncf %32 : vector<32x96xf32> to vector<32x96xbf16>
    %c0_8 = arith.constant 0 : index
    %c0_9 = arith.constant 0 : index
    %c0_10 = arith.constant 0 : index
    %34 = vector.load %arg3[%c0_8, %c0_9, %c0_10] : memref<2x96x32xbf16, #tpu.memory_space<vmem>>, vector<1x96x32xbf16>
    %35 = vector.shape_cast %34 : vector<1x96x32xbf16> to vector<96x32xbf16>
    %cst_11 = arith.constant dense<0.000000e+00> : vector<32x32xf32>
    %36 = tpu.matmul %33, %35, %cst_11 {dimension_numbers = #tpu.dot_dimension_numbers<[1], [0], [0], [1], [0, 0, 1, 1], [], []>} : vector<32x96xbf16>, vector<96x32xbf16>, vector<32x32xf32> -> vector<32x32xf32>
    %c0_12 = arith.constant 0 : index
    %c0_13 = arith.constant 0 : index
    %c0_14 = arith.constant 0 : index
    %37 = vector.load %arg4[%c0_12, %c0_13, %c0_14] : memref<2x1x32xf32, #tpu.memory_space<vmem>>, vector<1x1x32xf32>
    %38 = vector.shape_cast %37 : vector<1x1x32xf32> to vector<1x32xf32>
    %39 = vector.broadcast %38 : vector<1x32xf32> to vector<32x32xf32>
    %40 = arith.addf %36, %39 : vector<32x32xf32>
    %cst_15 = arith.constant 0.000000e+00 : f32
    %41 = vector.broadcast %cst_15 : f32 to vector<32x32xf32>
    %42 = arith.maximumf %40, %41 : vector<32x32xf32>
    %c1_i32_16 = arith.constant 1 : i32
    %43 = tpu.dynamic_rotate %42 by %c1_i32_16 dim 0 : vector<32x32xf32>, i32 -> vector<32x32xf32>
    %cst_17 = arith.constant 0.000000e+00 : f32
    %44 = vector.shape_cast %12 : vector<32x1xi1> to vector<32x1xi1>
    %45 = vector.broadcast %44 : vector<32x1xi1> to vector<32x32xi1>
    %46 = vector.broadcast %cst_17 : f32 to vector<32x32xf32>
    %47 = arith.select %45, %43, %46 : vector<32x32xi1>, vector<32x32xf32>
    %c31_i32_18 = arith.constant 31 : i32
    %48 = tpu.dynamic_rotate %42 by %c31_i32_18 dim 0 : vector<32x32xf32>, i32 -> vector<32x32xf32>
    %cst_19 = arith.constant 0.000000e+00 : f32
    %49 = vector.shape_cast %21 : vector<32x1xi1> to vector<32x1xi1>
    %50 = vector.broadcast %49 : vector<32x1xi1> to vector<32x32xi1>
    %51 = vector.broadcast %cst_19 : f32 to vector<32x32xf32>
    %52 = arith.select %50, %48, %51 : vector<32x32xi1>, vector<32x32xf32>
    %53 = tpu.concatenate %47, %42, %52 in 1 : vector<32x32xf32>, vector<32x32xf32>, vector<32x32xf32> -> vector<32x96xf32>
    %54 = arith.truncf %53 : vector<32x96xf32> to vector<32x96xbf16>
    %c1 = arith.constant 1 : index
    %c0_20 = arith.constant 0 : index
    %c0_21 = arith.constant 0 : index
    %55 = vector.load %arg3[%c1, %c0_20, %c0_21] : memref<2x96x32xbf16, #tpu.memory_space<vmem>>, vector<1x96x32xbf16>
    %56 = vector.shape_cast %55 : vector<1x96x32xbf16> to vector<96x32xbf16>
    %cst_22 = arith.constant dense<0.000000e+00> : vector<32x32xf32>
    %57 = tpu.matmul %54, %56, %cst_22 {dimension_numbers = #tpu.dot_dimension_numbers<[1], [0], [0], [1], [0, 0, 1, 1], [], []>} : vector<32x96xbf16>, vector<96x32xbf16>, vector<32x32xf32> -> vector<32x32xf32>
    %c1_23 = arith.constant 1 : index
    %c0_24 = arith.constant 0 : index
    %c0_25 = arith.constant 0 : index
    %58 = vector.load %arg4[%c1_23, %c0_24, %c0_25] : memref<2x1x32xf32, #tpu.memory_space<vmem>>, vector<1x1x32xf32>
    %59 = vector.shape_cast %58 : vector<1x1x32xf32> to vector<1x32xf32>
    %60 = vector.broadcast %59 : vector<1x32xf32> to vector<32x32xf32>
    %61 = arith.addf %57, %60 : vector<32x32xf32>
    %cst_26 = arith.constant 0.000000e+00 : f32
    %62 = vector.broadcast %cst_26 : f32 to vector<32x32xf32>
    %63 = arith.maximumf %61, %62 : vector<32x32xf32>
    %c0_27 = arith.constant 0 : index
    %c0_28 = arith.constant 0 : index
    %64 = vector.load %arg5[%c0_27, %c0_28] : memref<1x32xf32, #tpu.memory_space<vmem>>, vector<1x32xf32>
    %65 = vector.shape_cast %64 : vector<1x32xf32> to vector<1x1x32xf32>
    %66 = vector.shape_cast %63 : vector<32x32xf32> to vector<2x16x32xf32>
    %67 = vector.broadcast %65 : vector<1x1x32xf32> to vector<2x16x32xf32>
    %68 = arith.mulf %66, %67 : vector<2x16x32xf32>
    %cst_29 = arith.constant dense<0.000000e+00> : vector<2x16xf32>
    %69 = vector.multi_reduction <add>, %68, %cst_29 [2] : vector<2x16x32xf32> to vector<2x16xf32>
    %c0_30 = arith.constant 0 : index
    %c0_31 = arith.constant 0 : index
    %70 = memref.load %arg6[%c0_30, %c0_31] : memref<1x1xf32, #tpu.memory_space<smem>>
    %71 = vector.broadcast %70 : f32 to vector<2x16xf32>
    %72 = arith.addf %69, %71 : vector<2x16xf32>
    %73 = arith.negf %72 : vector<2x16xf32>
    %74 = math.exp %73 : vector<2x16xf32>
    %cst_32 = arith.constant 1.000000e+00 : f32
    %75 = vector.broadcast %cst_32 : f32 to vector<2x16xf32>
    %76 = arith.addf %75, %74 : vector<2x16xf32>
    %77 = arith.divf %75, %76 : vector<2x16xf32>
    %78 = tpu.iota {dimensions = array<i32: 1>} : vector<2x16xi32>
    %c0_33 = arith.constant 0 : index
    %c0_34 = arith.constant 0 : index
    %79 = vector.load %arg2[%c0_33, %c0_34] : memref<2x1xi32, #tpu.memory_space<vmem>>, vector<2x1xi32>
    %80 = vector.broadcast %79 : vector<2x1xi32> to vector<2x16xi32>
    %81 = arith.cmpi slt, %78, %80 : vector<2x16xi32>
    %cst_35 = arith.constant 0.000000e+00 : f32
    %82 = vector.broadcast %cst_35 : f32 to vector<2x16xf32>
    %83 = arith.select %81, %77, %82 : vector<2x16xi1>, vector<2x16xf32>
    %c0_36 = arith.constant 0 : index
    %c0_37 = arith.constant 0 : index
    %84 = vector.load %arg7[%c0_36, %c0_37] : memref<2x16xf32, #tpu.memory_space<vmem>>, vector<2x16xf32>
    tpu.vector_store %arg7[%c0_36, %c0_37], %83 {strides = array<i32>} : memref<2x16xf32, #tpu.memory_space<vmem>>, vector<2x16xf32>,
    return
  }
  func.func @transform_0(%arg0: i32) -> (i32, i32, i32) {
    %c0_i32 = arith.constant 0 : i32
    %c0_i32_0 = arith.constant 0 : i32
    %c0_i32_1 = arith.constant 0 : i32
    return %arg0, %c0_i32, %c0_i32_0 : i32, i32, i32
  }
  func.func @transform_1(%arg0: i32) -> (i32, i32) {
    %c0_i32 = arith.constant 0 : i32
    %c0_i32_0 = arith.constant 0 : i32
    return %arg0, %c0_i32 : i32, i32
  }
  func.func @transform_2(%arg0: i32) -> (i32, i32, i32) {
    %c0_i32 = arith.constant 0 : i32
    %c0_i32_0 = arith.constant 0 : i32
    %c0_i32_1 = arith.constant 0 : i32
    %c0_i32_2 = arith.constant 0 : i32
    return %c0_i32, %c0_i32_0, %c0_i32_1 : i32, i32, i32
  }
  func.func @transform_3(%arg0: i32) -> (i32, i32, i32) {
    %c0_i32 = arith.constant 0 : i32
    %c0_i32_0 = arith.constant 0 : i32
    %c0_i32_1 = arith.constant 0 : i32
    %c0_i32_2 = arith.constant 0 : i32
    return %c0_i32, %c0_i32_0, %c0_i32_1 : i32, i32, i32
  }
  func.func @transform_4(%arg0: i32) -> (i32, i32) {
    %c0_i32 = arith.constant 0 : i32
    %c0_i32_0 = arith.constant 0 : i32
    %c0_i32_1 = arith.constant 0 : i32
    return %c0_i32, %c0_i32_0 : i32, i32
  }
  func.func @transform_5(%arg0: i32) -> (i32, i32) {
    %c0_i32 = arith.constant 0 : i32
    %c0_i32_0 = arith.constant 0 : i32
    %c0_i32_1 = arith.constant 0 : i32
    return %c0_i32, %c0_i32_0 : i32, i32
  }
  func.func @transform_6(%arg0: i32) -> (i32, i32) {
    %c0_i32 = arith.constant 0 : i32
    %c0_i32_0 = arith.constant 0 : i32
    return %arg0, %c0_i32 : i32, i32
  }
}

</mosaic_0001>

<bundles_post_ra>
// kernel: tpu_custom_call.1
= control target key start
LH: loop header
LB: loop body
LE: loop exit
PB: predicated region body
PF: predicated region fallthrough
CT: control target
= control target key end

     0   :  { %v30_v3 = vlaneseq  ;;  %s685_s9 = smov 32   ;;  %s918_s0 = inlined_call_operand.vmem [shape: f32[2,16,32], index: 0, kind: input, shape index: {}]   ;;  %s919_s1 = inlined_call_operand.vmem [shape: s32[2,1], index: 1, kind: input, shape index: {}]   ;;  %s920_s2 = inlined_call_operand.vmem [shape: bf16[2,96,32], index: 2, kind: input, shape index: {}]   ;;  %s921_s3 = inlined_call_operand.vmem [shape: f32[2,1,32], index: 3, kind: input, shape index: {}]   ;;  %s922_s4 = inlined_call_operand.vmem [shape: f32[1,32], index: 4, kind: input, shape index: {}]   ;;  %s923_s5 = inlined_call_operand.<no memory space> [shape: f32[1,1], index: 5, kind: input, shape index: {}]   ;;  %s924_s6 = inlined_call_operand.hbm [shape: f32[2,16], index: 6, kind: output, shape index: {}]  }
   0x1   :  { %v28_v0 = vld [vmem:[%s918_s0 + $0x10] sm:$0xff]  ;;  %v29_v1 = vld [vmem:[%s918_s0 + $0x18] sm:$0xff]  ;;  %v26_v2 = vld [vmem:[%s918_s0] sm:$0xff] }
   0x2   :  { %v598_v4 = vpack.i.bf16 %v29_v1, %v28_v0  ;;  %v27_v5 = vld [vmem:[%s918_s0 + $0x8] sm:$0xff]  ;;  %v69_v7 = vrot.slane %v29_v1, 1  ;;  %v574_v9 = vld [vmem:[%s920_s2 + $0x20] sm:$0xff]  ;;  %v68_v10 = vrot.slane %v28_v0, 1  ;;  %v66_v12 = vrot.slane %v26_v2, 1 }
   0x3   :  { %v575_v6 = vld [vmem:[%s920_s2 + $0x28] sm:$0xff]  ;;  %v608_v8 = vpack.i.bf16 %v27_v5, %v26_v2  ;;  %v67_v11 = vrot.slane %v27_v5, 1  ;;  %v744_v13 = vshrl.u32 %v30_v3, 7 }
   0x4   :  { %599 = vrot.lane.b32.xlu0 %v598_v4, %s685_s9  ;;  %188 = vmatpush.bf16.msra.mxu0 %v575_v6 }
   0x5   :  { %609 = vrot.lane.b32.xlu1 %v608_v8, %s685_s9  ;;  %582 = vmatpush.bf16.msra.mxu2 %v575_v6 }
   0x6   :  { %12 = vsyncpa [#allocation4], 0  ;;  %v32_v14 = vadd.s32 8, %v744_v13  ;;  %vm70_vm0 = vcmp.lt.s32.totalorder %v744_v13, 7  ;;  %v573_v18 = vld [vmem:[%s920_s2 + $0x18] sm:$0xff]  ;;  %s686_s11 = smov 64  }
   0x7   :  { %v74_v16 = vsel %vm70_vm0, %v69_v7, %v66_v12  ;;  %v72_v17 = vsel %vm70_vm0, %v67_v11, %v68_v10  ;;  %v71_v19 = vsel %vm70_vm0, %v68_v10, %v69_v7  ;;  %v73_v20 = vsel %vm70_vm0, %v66_v12, %v67_v11  ;;  %v572_v33 = vld [vmem:[%s920_s2 + $0x10] sm:$0xff]  ;;  %v571_v34 = vld [vmem:[%s920_s2 + $0x8] sm:$0xff]  ;;  %v570_v35 = vld [vmem:[%s920_s2] sm:$0xff]  ;;  %s492_s14 = sshll.u32 %s924_s6, 4  ;;  %s493_s14 = int_to_ptr.hbm [resolvable:$true] %s492_s14 }
   0x8   :  { %v749_v15 = vadd.s32 1, %v32_v14  ;;  %189 = vmatpush.bf16.msra.mxu0 %v574_v9  ;;  %v51_v25 = vrot.slane %v28_v0, 7  ;;  %v50_v26 = vrot.slane %v27_v5, 7  ;;  %v52_v27 = vrot.slane %v29_v1, 7  ;;  %v581_v61 = vld [vmem:[%s920_s2 + $0x58] sm:$0xff]  ;;  %v580_v62 = vld [vmem:[%s920_s2 + $0x50] sm:$0xff] }
   0x9   :  { %583 = vmatpush.bf16.msra.mxu2 %v574_v9  ;;  %v49_v28 = vrot.slane %v26_v2, 7  ;;  %vm53_vm2 = vcmp.lt.s32.totalorder %v744_v13, 1  ;;  %v788_v38 = vadd.s32 4294967295, %v744_v13  ;;  %vm115_vm4 = vcmask 261120   ;;  %588 = vmatpush.bf16.msra.mxu3 %v581_v61  ;;  %v640_v63 = vld [vmem:[%s921_s3] ss:$0 sm:$0xff] }
   0xa   :  { %vm46_vm1 = vcmp.lt.s32.totalorder %v749_v15, 16  ;;  %v54_v29 = vsel %vm53_vm2, %v51_v25, %v52_v27  ;;  %v55_v30 = vsel %vm53_vm2, %v50_v26, %v51_v25  ;;  %vm120_vm5 = vcmask 523264   ;;  %337 = vmatpush.bf16.msra.mxu1 %v581_v61  ;;  %v579_v1 = vld [vmem:[%s920_s2 + $0x48] sm:$0xff]  ;;  %v576_v13 = vld [vmem:[%s920_s2 + $0x30] sm:$0xff] }
   0xb   :  { %v82_v21 = vsel %vm46_vm1, %v74_v16, 0.0  ;;  %v80_v22 = vsel %vm46_vm1, %v72_v17, 0.0  ;;  %v56_v31 = vsel %vm53_vm2, %v49_v28, %v50_v26  ;;  %v57_v32 = vsel %vm53_vm2, %v52_v27, %v49_v28 }
   0xc   :  { %v603_v23 = vpack.i.bf16 %v82_v21, %v71_v19  ;;  %v613_v24 = vpack.i.bf16 %v80_v22, %v73_v20  ;;  %190 = vmatpush.bf16.msra.mxu0 %v573_v18  ;;  %vm35_vm3 = vcmp.ge.s32.totalorder %v788_v38, 0  ;;  %vm179_vm6 = vcmask 785408   ;;  %v641_v38 = vld [vmem:[%s921_s3 + $0x1] ss:$0 sm:$0xff] }
   0xd   :  { %584 = vmatpush.bf16.msra.mxu2 %v573_v18  ;;  %v64_v43 = vsel %vm35_vm3, %v55_v30, 0.0  ;;  %v62_v44 = vsel %vm35_vm3, %v57_v32, 0.0  ;;  %589 = vmatpush.bf16.msra.mxu3 %v580_v62 }
   0xe   :  { %604 = vrot.lane.b32.xlu0 %v603_v23, %s686_s11  ;;  %614 = vrot.lane.b32.xlu1 %v613_v24, %s686_s11 }
   0xf   :  { %338 = vmatpush.bf16.msra.mxu1 %v580_v62 }
  0x10   :  { %191 = vmatpush.bf16.msra.mxu0 %v572_v33 }
  0x11   :  { %585 = vmatpush.bf16.msra.mxu2 %v572_v33  ;;  %590 = vmatpush.bf16.msra.mxu3 %v579_v1 }
  0x13   :  { %339 = vmatpush.bf16.msra.mxu1 %v579_v1 }
  0x14   :  { %192 = vmatpush.bf16.msra.mxu0 %v571_v34 }
  0x15   :  { %586 = vmatpush.bf16.msra.mxu2 %v571_v34 }
  0x18   :  { %193 = vmatpush.bf16.msra.mxu0 %v570_v35 }
  0x19   :  { %587 = vmatpush.bf16.msra.mxu2 %v570_v35 }
  0x76   :  { %v600_v36 = vpop.permute.xlu0 %599 }
  0x77   :  { %v610_v37 = vpop.permute.xlu1 %609  ;;  %v602_v39 = vunpack.i.h.bf16 %v600_v36  ;;  %v601_v40 = vunpack.i.l.bf16 %v600_v36 }
  0x78   :  { %v612_v41 = vunpack.i.h.bf16 %v610_v37  ;;  %v611_v42 = vunpack.i.l.bf16 %v610_v37 }
  0x79   :  { %v118_v51 = vsel %vm115_vm4, %v64_v43, %v601_v40  ;;  %v119_v52 = vsel %vm115_vm4, %v54_v29, %v602_v39  ;;  %v578_v39 = vld [vmem:[%s920_s2 + $0x40] sm:$0xff]  ;;  %v577_v40 = vld [vmem:[%s920_s2 + $0x38] sm:$0xff] }
  0x7a   :  { %v116_v53 = vsel %vm115_vm4, %v62_v44, %v611_v42  ;;  %v117_v54 = vsel %vm115_vm4, %v56_v31, %v612_v41  ;;  %591 = vmatpush.bf16.msra.mxu3 %v578_v39  ;;  %340 = vmatpush.bf16.msra.mxu1 %v578_v39 }
  0x7e   :  { %592 = vmatpush.bf16.msra.mxu3 %v577_v40  ;;  %341 = vmatpush.bf16.msra.mxu1 %v577_v40 }
  0x80   :  { %v605_v45 = vpop.permute.xlu0 %604  ;;  %v615_v46 = vpop.permute.xlu1 %614 }
  0x81   :  { %v607_v47 = vunpack.i.h.bf16 %v605_v45  ;;  %v606_v48 = vunpack.i.l.bf16 %v605_v45  ;;  %v617_v49 = vunpack.i.h.bf16 %v615_v46  ;;  %v616_v50 = vunpack.i.l.bf16 %v615_v46 }
  0x82   :  { %593 = vmatpush.bf16.msra.mxu3 %v576_v13  ;;  %342 = vmatpush.bf16.msra.mxu1 %v576_v13 }
  0x83   :  { %v121_v55 = vsel %vm120_vm5, %v116_v53, %v616_v50  ;;  %v122_v56 = vsel %vm120_vm5, %v117_v54, %v617_v49  ;;  %v123_v57 = vsel %vm120_vm5, %v118_v51, %v606_v48  ;;  %v124_v58 = vsel %vm120_vm5, %v119_v52, %v607_v47 }
  0x84   :  { %v125_v59 = vpack.c.bf16 %v122_v56, %v121_v55  ;;  %v126_v60 = vpack.c.bf16 %v124_v58, %v123_v57 }
  0x86   :  { %525 = vmatmul.msk.bf16.vlgmr.msra.gmra.mxu0 %vm179_vm6, %v125_v59  ;;  %526 = vmatmul.msk.bf16.vlgmr.msra.gmra.mxu2 %vm179_vm6, %v126_v60 }
 0x103   :  { %v195_v0 = vpop.f32.mrf.mxu0 }
 0x104   :  { %v196_v2 = vadd.f32 %v640_v63, %v195_v0  ;;  %v687_v0 = vmov 0  }
 0x105   :  { %638 = vset.pattern.permute.xlu2 %v687_v0  ;;  %639 = vset.pattern.permute.xlu0 %v687_v0 }
 0x106   :  { %v205_v6 = vmax.f32 %v196_v2, 0.0 }
 0x108   :  { %v221_v11 = vrot.slane %v205_v6, 1  ;;  %v209_v19 = vrot.slane %v205_v6, 7 }
 0x109   :  { %v200_v4 = vpop.f32.mrf.mxu2 }
 0x10a   :  { %v201_v5 = vadd.f32 %v640_v63, %v200_v4  ;;  %v642_v4 = vld [vmem:[%s922_s4] ss:$0 sm:$0xff] }
 0x10b   :  { %v197_v7 = vpop.f32.mrf.mxu0 }
 0x10c   :  { %v207_v8 = vmax.f32 %v201_v5, 0.0  ;;  %v198_v9 = vadd.f32 %v640_v63, %v197_v7 }
 0x10e   :  { %v206_v10 = vmax.f32 %v198_v9, 0.0  ;;  %v211_v12 = vrot.slane %v207_v8, 7  ;;  %v223_v14 = vrot.slane %v207_v8, 1 }
 0x110   :  { %v210_v16 = vrot.slane %v206_v10, 7  ;;  %v222_v17 = vrot.slane %v206_v10, 1  ;;  %v628_v18 = vpack.i.bf16 %v206_v10, %v205_v6 }
 0x111   :  { %v202_v20 = vpop.f32.mrf.mxu2 }
 0x112   :  { %v203_v21 = vadd.f32 %v640_v63, %v202_v20  ;;  %629 = vrot.lane.b32.xlu0 %v628_v18, %s685_s9  ;;  %v226_v22 = vsel %vm70_vm0, %v222_v17, %v223_v14  ;;  %v227_v23 = vsel %vm70_vm0, %v221_v11, %v222_v17  ;;  %v214_v24 = vsel %vm53_vm2, %v210_v16, %v211_v12 }
 0x113   :  { %v230_v25 = vsel %vm46_vm1, %v226_v22, 0.0  ;;  %v215_v26 = vsel %vm53_vm2, %v209_v19, %v210_v16  ;;  %v219_v44 = vsel %vm35_vm3, %v214_v24, 0.0 }
 0x114   :  { %v208_v27 = vmax.f32 %v203_v21, 0.0  ;;  %v633_v28 = vpack.i.bf16 %v230_v25, %v227_v23  ;;  %v462_v25 = vld [vmem:[%s919_s1] sm:$0x3]  ;;  %s688_s1 = smov [#allocation3]  }
 0x116   :  { %v212_v29 = vrot.slane %v208_v27, 7  ;;  %v224_v30 = vrot.slane %v208_v27, 1  ;;  %634 = vrot.lane.b32.xlu1 %v633_v28, %s686_s11  ;;  %v618_v31 = vpack.i.bf16 %v208_v27, %v207_v8 }
 0x118   :  { %619 = vrot.lane.b32.xlu2 %v618_v31, %s685_s9  ;;  %v228_v32 = vsel %vm70_vm0, %v224_v30, %v221_v11  ;;  %v213_v33 = vsel %vm53_vm2, %v211_v12, %v212_v29  ;;  %v216_v34 = vsel %vm53_vm2, %v212_v29, %v209_v19  ;;  %v225_v35 = vsel %vm70_vm0, %v223_v14, %v224_v30 }
 0x119   :  { %v232_v36 = vsel %vm46_vm1, %v228_v32, 0.0  ;;  %v217_v56 = vsel %vm35_vm3, %v216_v34, 0.0 }
 0x11a   :  { %v623_v37 = vpack.i.bf16 %v232_v36, %v225_v35 }
 0x120   :  { %624 = vrot.lane.b32.xlu2 %v623_v37, %s686_s11 }
 0x172   :  { %v620_v15 = vpop.permute.xlu2 %619 }
 0x173   :  { %v622_v41 = vunpack.i.h.bf16 %v620_v15  ;;  %v621_v42 = vunpack.i.l.bf16 %v620_v15 }
 0x175   :  { %v267_v47 = vsel %vm115_vm4, %v219_v44, %v621_v42  ;;  %v268_v48 = vsel %vm115_vm4, %v213_v33, %v622_v41 }
 0x17a   :  { %v625_v43 = vpop.permute.xlu2 %624 }
 0x17b   :  { %v627_v45 = vunpack.i.h.bf16 %v625_v43  ;;  %v626_v46 = vunpack.i.l.bf16 %v625_v43 }
 0x17d   :  { %v271_v49 = vsel %vm120_vm5, %v267_v47, %v626_v46  ;;  %v272_v50 = vsel %vm120_vm5, %v268_v48, %v627_v45 }
 0x17e   :  { %v274_v51 = vpack.c.bf16 %v272_v50, %v271_v49 }
 0x180   :  { %565 = vmatmul.msk.bf16.vlgmr.msra.gmra.mxu3 %vm179_vm6, %v274_v51 }
 0x184   :  { %v630_v52 = vpop.permute.xlu0 %629 }
 0x185   :  { %v632_v53 = vunpack.i.h.bf16 %v630_v52  ;;  %v631_v54 = vunpack.i.l.bf16 %v630_v52 }
 0x187   :  { %v265_v59 = vsel %vm115_vm4, %v217_v56, %v631_v54  ;;  %v266_v60 = vsel %vm115_vm4, %v215_v26, %v632_v53  ;;  %v379_v26 = vstv %s923_s5  ;;  %v885_v56 = vand.u32 127, %v30_v3  ;;  %s490_s5 = sshll.u32 %s688_s1, 4  ;;  %s491_s5 = int_to_ptr.vmem [resolvable:$true] %s490_s5 }
 0x188   :  { %v635_v55 = vpop.permute.xlu1 %634 }
 0x189   :  { %v637_v57 = vunpack.i.h.bf16 %v635_v55  ;;  %v636_v58 = vunpack.i.l.bf16 %v635_v55 }
 0x18b   :  { %v269_v61 = vsel %vm120_vm5, %v265_v59, %v636_v58  ;;  %v270_v62 = vsel %vm120_vm5, %v266_v60, %v637_v57 }
 0x18c   :  { %v273_v63 = vpack.c.bf16 %v270_v62, %v269_v61 }
 0x18e   :  { %564 = vmatmul.msk.bf16.vlgmr.msra.gmra.mxu1 %vm179_vm6, %v273_v63  ;;  %vm474_vm6 = vcmask 130112  }
 0x203   :  { %v349_v1 = vpop.f32.mrf.mxu3 }
 0x204   :  { %v350_v2 = vadd.f32 %v641_v38, %v349_v1 }
 0x206   :  { %v356_v5 = vmax.f32 %v350_v2, 0.0 }
 0x208   :  { %v364_v6 = vmul.f32 %v642_v4, %v356_v5  ;;  %v472_v5 = vadd.s32 4294967288, %v885_v56 }
 0x20a   :  { %v372_v7 = vsel %vm115_vm4, %v364_v6, 0.0 }
 0x20b   :  { %v351_v8 = vpop.f32.mrf.mxu3  ;;  %373 = vadd.xlane.f32.xlu1 %v372_v7  ;;  %v344_v9 = vpop.f32.mrf.mxu1 }
 0x20c   :  { %v345_v10 = vadd.f32 %v641_v38, %v344_v9  ;;  %v352_v11 = vadd.f32 %v641_v38, %v351_v8 }
 0x20e   :  { %v354_v12 = vmax.f32 %v345_v10, 0.0  ;;  %v357_v16 = vmax.f32 %v352_v11, 0.0 }
 0x210   :  { %v362_v14 = vmul.f32 %v642_v4, %v354_v12  ;;  %v365_v21 = vmul.f32 %v642_v4, %v357_v16 }
 0x212   :  { %v366_v17 = vsel %vm115_vm4, %v362_v14, 0.0  ;;  %v375_v24 = vsel %vm115_vm4, %v365_v21, 0.0 }
 0x213   :  { %v346_v18 = vpop.f32.mrf.mxu1  ;;  %367 = vadd.xlane.f32.xlu2 %v366_v17 }
 0x214   :  { %v347_v19 = vadd.f32 %v641_v38, %v346_v18 }
 0x216   :  { %v355_v20 = vmax.f32 %v347_v19, 0.0 }
 0x218   :  { %v363_v22 = vmul.f32 %v642_v4, %v355_v20 }
 0x21a   :  { %v369_v23 = vsel %vm115_vm4, %v363_v22, 0.0 }
 0x21b   :  { %370 = vadd.xlane.f32.xlu0 %v369_v23  ;;  %376 = vadd.xlane.f32.xlu2 %v375_v24 }
 0x233   :  { %464 = vperm.xlu2 %638, %v462_v25  }
 0x27e   :  { %v374_v27 = vpop.xlane.xlu1 %373 }
 0x27f   :  { %v382_v28 = vadd.f32 %v379_v26, %v374_v27 }
 0x281   :  { %v568_v29 = vmul.f32 -1.442695, %v382_v28 }
 0x283   :  { %643 = vpow2.f32 %v568_v29 }
 0x286   :  { %v368_v30 = vpop.xlane.xlu2 %367 }
 0x287   :  { %v380_v31 = vadd.f32 %v379_v26, %v368_v30 }
 0x289   :  { %v644_v32 = vpop.eup %643  ;;  %v566_v33 = vmul.f32 -1.442695, %v380_v31 }
 0x28a   :  { %v880_v34 = vadd.f32 1.0, %v644_v32 }
 0x28b   :  { %645 = vpow2.f32 %v566_v33 }
 0x28c   :  { %647 = vrcp.f32 %v880_v34  ;;  %vm435_vm8 = vweird.f32 %v880_v34  ;;  %v439_v62 = vand.u32 2147483647, %v880_v34  ;;  %v441_v38 = vand.u32 2147483648, %v880_v34 }
 0x28e   :  { %v371_v35 = vpop.xlane.xlu0 %370  ;;  %v377_v36 = vpop.xlane.xlu2 %376  ;;  %vm440_vm2 = vcmp.eq.f32.partialorder %v439_v62, 8.507059e+37  ;;  %v442_v20 = vor.u32 1.1754944e-38, %v441_v38 }
 0x28f   :  { %v381_v37 = vadd.f32 %v379_v26, %v371_v35  ;;  %v383_v39 = vadd.f32 %v379_v26, %v377_v36 }
 0x291   :  { %v646_v40 = vpop.eup %645  ;;  %v567_v13 = vmul.f32 -1.442695, %v381_v37  ;;  %v569_v15 = vmul.f32 -1.442695, %v383_v39 }
 0x292   :  { %v396_v41 = vadd.f32 1.0, %v646_v40  ;;  %v648_v42 = vpop.eup %647 }
 0x293   :  { %649 = vpow2.f32 %v567_v13  ;;  %v431_v43 = vmul.f32 %v648_v42, %v880_v34  ;;  %vm436_vm9 = vweird.f32 %v648_v42 }
 0x294   :  { %651 = vrcp.f32 %v396_v41  ;;  %v409_v55 = vand.u32 2147483647, %v396_v41  ;;  %v411_v60 = vand.u32 2147483648, %v396_v41  ;;  %vm405_vm10 = vweird.f32 %v396_v41  ;;  %vm904_vm14 = vmor %vm435_vm8, %vm436_vm9 }
 0x295   :  { %653 = vpow2.f32 %v569_v15  ;;  %v432_v49 = vsub.f32 1.0, %v431_v43  ;;  %vm479_vm8 = vcmask 1041409  }
 0x296   :  { %vm894_vm12 = vcmp.eq.f32.partialorder %v409_v55, 8.507059e+37  ;;  %v412_v10 = vor.u32 1.1754944e-38, %v411_v60  ;;  %v465_v29 = vpop.permute.xlu2 %464 }
 0x297   :  { %v433_v53 = vmul.f32 %v648_v42, %v432_v49  ;;  %vm466_vm9 = vcmp.lt.s32.totalorder %v885_v56, %v465_v29 }
 0x299   :  { %v650_v44 = vpop.eup %649  ;;  %v434_v61 = vadd.f32 %v648_v42, %v433_v53 }
 0x29a   :  { %v652_v45 = vpop.eup %651  ;;  %v397_v46 = vadd.f32 1.0, %v650_v44 }
 0x29b   :  { %v654_v47 = vpop.eup %653  ;;  %v401_v48 = vmul.f32 %v652_v45, %v396_v41  ;;  %vm406_vm7 = vweird.f32 %v652_v45  ;;  %v438_v11 = vsel %vm904_vm14, %v648_v42, %v434_v61 }
 0x29c   :  { %655 = vrcp.f32 %v397_v46  ;;  %v399_v50 = vadd.f32 1.0, %v654_v47  ;;  %vm890_vm11 = vmor %vm405_vm10, %vm406_vm7  ;;  %v424_v2 = vand.u32 2147483647, %v397_v46  ;;  %v426_v4 = vand.u32 2147483648, %v397_v46 }
 0x29d   :  { %v402_v51 = vsub.f32 1.0, %v401_v48  ;;  %vm420_vm15 = vweird.f32 %v397_v46  ;;  %v443_v24 = vsel %vm440_vm2, %v442_v20, %v438_v11  ;;  %vm483_vm10 = vcmask 123904  }
 0x29e   :  { %657 = vrcp.f32 %v399_v50  ;;  %v456_v12 = vand.u32 2147483648, %v399_v50  ;;  %v454_v17 = vand.u32 2147483647, %v399_v50  ;;  %v427_v19 = vor.u32 1.1754944e-38, %v426_v4 }
 0x29f   :  { %v403_v52 = vmul.f32 %v652_v45, %v402_v51  ;;  %vm425_vm3 = vcmp.eq.f32.partialorder %v424_v2, 8.507059e+37  ;;  %vm450_vm4 = vweird.f32 %v399_v50  ;;  %v476_v32 = vperm.slane %v443_v24, %v885_v56 }
 0x2a0   :  { %v457_v25 = vor.u32 1.1754944e-38, %v456_v12  ;;  %vm455_vm7 = vcmp.eq.f32.partialorder %v454_v17, 8.507059e+37 }
 0x2a1   :  { %v404_v58 = vadd.f32 %v652_v45, %v403_v52 }
 0x2a2   :  { %v656_v54 = vpop.eup %655 }
 0x2a3   :  { %v416_v57 = vmul.f32 %v656_v54, %v397_v46  ;;  %v408_v8 = vsel %vm890_vm11, %v652_v45, %v404_v58  ;;  %vm421_vm13 = vweird.f32 %v656_v54 }
 0x2a4   :  { %v658_v59 = vpop.eup %657  ;;  %v413_v18 = vsel %vm894_vm12, %v412_v10, %v408_v8  ;;  %vm422_vm1 = vmor %vm420_vm15, %vm421_vm13 }
 0x2a5   :  { %v417_v63 = vsub.f32 1.0, %v416_v57  ;;  %v446_v0 = vmul.f32 %v658_v59, %v399_v50  ;;  %vm451_vm0 = vweird.f32 %v658_v59  ;;  %v471_v27 = vperm.slane %v413_v18, %v885_v56 }
 0x2a6   :  { %vm452_vm5 = vmor %vm450_vm4, %vm451_vm0 }
 0x2a7   :  { %v418_v6 = vmul.f32 %v656_v54, %v417_v63  ;;  %v447_v7 = vsub.f32 1.0, %v446_v0 }
 0x2a9   :  { %v448_v14 = vmul.f32 %v658_v59, %v447_v7  ;;  %v419_v16 = vadd.f32 %v656_v54, %v418_v6 }
 0x2ab   :  { %v423_v21 = vsel %vm422_vm1, %v656_v54, %v419_v16  ;;  %v449_v22 = vadd.f32 %v658_v59, %v448_v14 }
 0x2ac   :  { %v428_v23 = vsel %vm425_vm3, %v427_v19, %v423_v21 }
 0x2ad   :  { %v453_v26 = vsel %vm452_vm5, %v658_v59, %v449_v22  ;;  %v473_v28 = vperm.slane %v428_v23, %v472_v5 }
 0x2ae   :  { %v458_v30 = vsel %vm455_vm7, %v457_v25, %v453_v26 }
 0x2af   :  { %v475_v31 = vsel %vm474_vm6, %v473_v28, %v471_v27  ;;  %v477_v33 = vperm.slane %v458_v30, %v472_v5 }
 0x2b1   :  { %v478_v34 = vsel %vm474_vm6, %v477_v33, %v476_v32 }
 0x2b2   :  { %v480_v35 = vsel %vm479_vm8, %v478_v34, %v475_v31 }
 0x2b3   :  { %v482_v36 = vsel %vm466_vm9, %v480_v35, 0.0 }
 0x2b4   :  { %484 = vst.msk [vmem:[#allocation3] sm:$0x3] %vm483_vm10, %v482_v36 }
 0x2b5   :  { %495 = dma.vmem_to_hbm [thread:$0]  %s491_s5, 32, %s493_s14, [#allocation4]  }
 0x2b6   :  { %683 = dma.done.wait [#allocation4], 32  }
 0x2b7   :  { %684 = vsyncadd [#allocation4], 4294967264 }
 0x2b8   :  { %500 = vsyncpa [#allocation4], 1 }

</bundles_post_ra>
